<compile_context>
chip_gen: v7x
topology: tpu7x:2x2x1
jax: 0.10.0
libtpu: 0.0.40
codegen_flags: <defaults>
</compile_context>

<pallas_src>
import jax
import jax.numpy as jnp
from jax.experimental import pallas as pl
from jax.experimental.pallas import tpu as pltpu


def init_encoding(d_model: int, max_seq_len: int) -> jnp.ndarray:
    """Sinusoidal table, mirrors PositionalEncoder.init_encoding exactly:
      encoding[:, 0::2] = sin(pos / 10000 ** (idx_even / d_model))
      encoding[:, 1::2] = cos(pos / 10000 ** ((idx_odd - 1) / d_model))
    """
    pos = jnp.arange(max_seq_len, dtype=jnp.float32).reshape(-1, 1)   # (L, 1)
    idx = jnp.arange(d_model, dtype=jnp.float32)                      # (D,)
    even_mask = (jnp.arange(d_model) % 2) == 0
    exponent = jnp.where(even_mask, idx, idx - 1.0) / float(d_model)
    inv_freq = jnp.power(10000.0, exponent)                           # (D,)
    angles = pos / inv_freq                                           # (L, D)
    return jnp.where(even_mask, jnp.sin(angles), jnp.cos(angles)).astype(jnp.float32)


def _add_pe_kernel(x_ref, pe_ref, o_ref):
    # x_ref: (TB, TL) tile of flattened embeds; pe_ref: (1, TL) table tile,
    # broadcast over the batch sublanes.  Widen to f32 for the add, cast on store.
    o_ref[...] = (
        x_ref[...].astype(jnp.float32) + pe_ref[...].astype(jnp.float32)
    ).astype(o_ref.dtype)


def _sublane_pack(itemsize: int) -> int:
    # sublane packing: 8 rows for 32-bit, 16 for bf16, 32 for int8/fp8
    return {4: 8, 2: 16, 1: 32}.get(itemsize, 8)


def _chip_params():
    """Per-generation tuning (trace-time, Python-level)."""
    try:
        kind = jax.devices()[0].device_kind.lower()
    except Exception:  # pragma: no cover - e.g. no devices during AOT tracing
        kind = ""
    if "v7" in kind:
        # ~2-4x v6e HBM BW: bigger blocks to amortize the ~0.35us per-step cost,
        # explicit VMEM limit with headroom under the 64 MiB physical VMEM,
        # and two TensorCores that both need work.
        return {"target_block_bytes": 4 * 1024 * 1024,
                "vmem_limit_bytes": 48 * 1024 * 1024,
                "two_tc": True}
    # v5e (16 MiB scoped default) and v6e (32 MiB): 2 MiB blocks are already at
    # the measured HBM roofline; bigger buys nothing and risks scoped-VMEM OOM.
    return {"target_block_bytes": 2 * 1024 * 1024,
            "vmem_limit_bytes": None,
            "two_tc": False}


def _tile_sizes(b: int, n: int, x_dtype, pe_dtype,
                target_block_bytes: int, vmem_budget_bytes: int):
    """Pick (tb, tl) using sublane-PADDED physical VMEM footprints."""
    x_item = jnp.dtype(x_dtype).itemsize
    pe_item = jnp.dtype(pe_dtype).itemsize
    x_pack = _sublane_pack(x_item)
    pe_pack = _sublane_pack(pe_item)

    tb = b if b <= x_pack else x_pack          # full dim, or a multiple of 8
    padded_tb = max(tb, x_pack)                # physical rows per x/out buffer

    # Double-buffered bytes per column of tl:
    #   2 x-in buffers + 2 out buffers (padded_tb rows) + 2 PE buffers (pe_pack rows)
    bytes_per_col = 2 * 2 * padded_tb * x_item + 2 * pe_pack * pe_item

    tl_from_target = target_block_bytes // max(1, padded_tb * x_item)
    tl_from_budget = vmem_budget_bytes // max(1, bytes_per_col)
    tl = min(tl_from_target, tl_from_budget)
    tl = max(128, (tl // 128) * 128)           # lane-dense: multiple of 128
    if tl >= n:
        tl = n                                 # full last dim (tiny shapes -> 1 tile)
    return tb, tl


@jax.jit
def positional_encode(embeds: jnp.ndarray, encoding: jnp.ndarray) -> jnp.ndarray:
    """embeds: (B, S, D); encoding: (max_seq_len, D). Returns embeds + encoding[:S].

    For bf16/fp8 activations, pre-cast `encoding` to the same narrow dtype once
    (outside the per-call path) to halve table traffic; the kernel widens to
    f32 for the add either way.
    """
    b, s, d = embeds.shape
    max_seq_len, d_enc = encoding.shape
    if s > max_seq_len:
        raise ValueError(f"seq_len={s} exceeds max_seq_len={max_seq_len}")
    if d != d_enc:
        raise ValueError(f"d_model mismatch: embeds has {d}, encoding has {d_enc}")

    chip = _chip_params()
    vmem_limit = chip["vmem_limit_bytes"]
    # Budget double-buffered blocks well under the scoped-VMEM ceiling:
    # 14 MiB fits the 16 MiB v5e default; 75% of the explicit limit on v7x.
    vmem_budget = int(vmem_limit * 0.75) if vmem_limit else 14 * 1024 * 1024

    # Flatten (S, D) -> one lane-contiguous trailing axis of length S*D.
    # The PE table is reshaped in full (free) instead of sliced+copied; only
    # the first cdiv(n, tl) column blocks are ever addressed by the index_map.
    n = s * d
    x2 = embeds.reshape(b, n)
    pe2 = encoding.reshape(1, max_seq_len * d)

    tb, tl = _tile_sizes(b, n, embeds.dtype, encoding.dtype,
                         chip["target_block_bytes"], vmem_budget)

    # v7x megacore: make sure the parallel grid has >= 2 tiles so both
    # TensorCores get work (a single TC cannot saturate the chip's HBM pipe).
    if chip["two_tc"] and pl.cdiv(n, tl) * pl.cdiv(b, tb) < 2 and n >= 256:
        tl = max(128, ((tl // 2) // 128) * 128)

    # Column tiles are the OUTER grid axis so the PE tile's block index is
    # unchanged across the inner batch-tile loop (no re-DMA of the table).
    grid = (pl.cdiv(n, tl), pl.cdiv(b, tb))

    out2 = pl.pallas_call(
        _add_pe_kernel,
        out_shape=jax.ShapeDtypeStruct((b, n), embeds.dtype),
        grid_spec=pltpu.PrefetchScalarGridSpec(
            num_scalar_prefetch=0,
            grid=grid,
            in_specs=[
                pl.BlockSpec((tb, tl), lambda j, i: (i, j)),   # embeds tile
                pl.BlockSpec((1, tl), lambda j, i: (0, j)),    # PE tile (batch-broadcast)
            ],
            out_specs=pl.BlockSpec((tb, tl), lambda j, i: (i, j)),
        ),
        compiler_params=pltpu.CompilerParams(
            dimension_semantics=("parallel", "parallel"),      # megacore-shardable
            vmem_limit_bytes=vmem_limit,
        ),
    )(x2, pe2)

    return out2.reshape(b, s, d)


if __name__ == "__main__":
    d_model = 32
    max_seq_len = 16
    batch = 2
    seq_len = 8

    key = jax.random.PRNGKey(0)
    embeds = jax.random.normal(key, (batch, seq_len, d_model), dtype=jnp.float32)
    encoding = init_encoding(d_model, max_seq_len)

    out = jax.block_until_ready(positional_encode(embeds, encoding))

    # sanity check against pure-JAX reference
    ref = embeds + encoding[:seq_len][None, :, :]
    assert out.shape == (batch, seq_len, d_model)
    assert jnp.allclose(out, ref, atol=1e-6, rtol=1e-6)

    print("KERNEL_OK")
</pallas_src>

<mosaic_0001>
module attributes {stable_mosaic.version = 11 : i64} {
  func.func @_add_pe_kernel(%arg0: i32, %arg1: i32, %arg2: memref<2x256xf32, #tpu.memory_space<vmem>>, %arg3: memref<1x256xf32, #tpu.memory_space<vmem>>, %arg4: memref<2x256xf32, #tpu.memory_space<vmem>>) attributes {dimension_semantics = [#tpu.dimension_semantics<parallel>, #tpu.dimension_semantics<parallel>], iteration_bounds = array<i64: 1, 1>, scalar_prefetch = 0 : i64, scratch_operands = 0 : i64, tpu.core_type = #tpu.core_type<tc>, window_params = [{transform_indices = @transform_0, window_bounds = array<i64: 2, 256>}, {transform_indices = @transform_1, window_bounds = array<i64: 1, 256>}, {transform_indices = @transform_2, window_bounds = array<i64: 2, 256>}]} {
    %c0 = arith.constant 0 : index
    %c0_0 = arith.constant 0 : index
    %0 = vector.load %arg2[%c0, %c0_0] : memref<2x256xf32, #tpu.memory_space<vmem>>, vector<2x256xf32>
    %c0_1 = arith.constant 0 : index
    %c0_2 = arith.constant 0 : index
    %1 = vector.load %arg3[%c0_1, %c0_2] : memref<1x256xf32, #tpu.memory_space<vmem>>, vector<1x256xf32>
    %2 = vector.broadcast %1 : vector<1x256xf32> to vector<2x256xf32>
    %3 = arith.addf %0, %2 : vector<2x256xf32>
    %c0_3 = arith.constant 0 : index
    %c0_4 = arith.constant 0 : index
    %4 = vector.load %arg4[%c0_3, %c0_4] : memref<2x256xf32, #tpu.memory_space<vmem>>, vector<2x256xf32>
    tpu.vector_store %arg4[%c0_3, %c0_4], %3 {strides = array<i32>} : memref<2x256xf32, #tpu.memory_space<vmem>>, vector<2x256xf32>,
    return
  }
  func.func @transform_0(%arg0: i32, %arg1: i32) -> (i32, i32) {
    %c0_i32 = arith.constant 0 : i32
    return %arg1, %arg0 : i32, i32
  }
  func.func @transform_1(%arg0: i32, %arg1: i32) -> (i32, i32) {
    %c0_i32 = arith.constant 0 : i32
    %c0_i32_0 = arith.constant 0 : i32
    return %c0_i32, %arg0 : i32, i32
  }
  func.func @transform_2(%arg0: i32, %arg1: i32) -> (i32, i32) {
    %c0_i32 = arith.constant 0 : i32
    return %arg1, %arg0 : i32, i32
  }
}

</mosaic_0001>

<bundles_post_ra>
// kernel: positional_encode.1
= control target key start
LH: loop header
LB: loop body
LE: loop exit
PB: predicated region body
PF: predicated region fallthrough
CT: control target
= control target key end

     0   :  { %v14_v0 = vlaneseq  ;;  %v38_v1 = vmov 1983009808   ;;  %s63_s1 = inlined_call_operand.vmem [shape: f32[1,512], index: 1, kind: input, shape index: {}]   ;;  %s64_s0 = inlined_call_operand.vmem [shape: f32[2,256], index: 0, kind: input, shape index: {}]   ;;  %s65_s2 = inlined_call_operand.vmem [shape: f32[2,256], index: 2, kind: output, shape index: {}]  }
   0x1   :  { %v24_v2 = vunpack.c.l.s4 %v38_v1  ;;  %v12_v4 = vld [vmem:[%s63_s1] sm:$0x3] }
   0x2   :  { %v15_v3 = vshrl.u32 %v14_v0, 7  ;;  %v11_v12 = vld [vmem:[%s64_s0] sm:$0xf] }
   0x3   :  { %v25_v5 = vunpack.c.0.s8 %v24_v2 }
   0x4   :  { %v16_v6 = vsub.s32 0, %v15_v3  ;;  %v20_v7 = vsub.s32 1, %v15_v3 }
   0x5   :  { %v28_v10 = vsub.s32 %v25_v5, %v15_v3 }
   0x6   :  { %v17_v8 = vrot.slane %v12_v4, %v16_v6  ;;  %v21_v9 = vrot.slane %v12_v4, %v20_v7 }
   0x8   :  { %v22_v11 = vcombine.low %v17_v8, %v21_v9 }
   0xa   :  { %v29_v13 = vrot.slane %v22_v11, %v28_v10 }
   0xc   :  { %v31_v14 = vadd.f32 %v29_v13, %v11_v12 }
   0xe   :  { %32 = vst [vmem:[%s65_s2] sm:$0xf] %v31_v14 }

</bundles_post_ra>
